<compile_context>
chip_gen: v7x
topology: tpu7x:2x2x1
jax: 0.10.0
libtpu: 0.0.40
codegen_flags: <defaults>
</compile_context>

<pallas_src>
import jax
import jax.numpy as jnp
from jax.experimental import pallas as pl
from jax.experimental.pallas import tpu as pltpu

LN_EPS = 1e-5  # PyTorch nn.LayerNorm default


# ----------------------------- small helpers -------------------------------


def _layernorm(x, w, b):
    mu = jnp.mean(x, axis=-1, keepdims=True)
    var = jnp.mean((x - mu) ** 2, axis=-1, keepdims=True)
    return (x - mu) * jax.lax.rsqrt(var + LN_EPS) * w + b


def _vmem_limit_bytes():
    # ~75% of the chip's VMEM, capped to leave runtime headroom.
    try:
        cap = int(pltpu.get_tpu_info().vmem_capacity_bytes)
    except Exception:
        cap = 64 * 1024 * 1024
    return min(int(cap * 3 // 4), 100 * 1024 * 1024)


def _pick_tile(n, target, align):
    """Largest divisor of n <= target, preferring multiples of `align`.

    Never silently returns an oversized tile: if n > target the result is a
    divisor of n that is <= target (worst case smaller / unaligned, still
    correct).
    # TODO(synk): a cdiv+padding path would handle pathological sizes better.
    """
    if n <= target:
        return n
    fallback = 1
    for d in range(min(target, n), 0, -1):
        if n % d:
            continue
        if d % align == 0:
            return d
        if fallback == 1:
            fallback = d
    return fallback


def _budget_tile(n, bytes_per_unit, align, frac=0.5, cap=4096):
    """Tile sized so streamed (double-buffered) weight tiles fit a VMEM budget."""
    budget = _vmem_limit_bytes() * frac
    target = int(max(align, min(cap, budget // max(bytes_per_unit, 1))))
    return _pick_tile(n, target, align)


# Row-tile target: weight-streaming arithmetic intensity ~= tm FLOPs/byte.
# Ridge is ~256 rows on v5e, ~320 on v7x, ~640 on v6e; 512 is a reasonable
# default (callers on v6e may pass a larger row_tile).
_ROW_TILE_TARGET = 512


# ----------------------------- Pallas kernels -------------------------------


def qkv_proj_kernel(x_ref, ln1w_ref, ln1b_ref, w_ref, b_ref, o_ref, h_scr):
    """Per-head fused QKV projection of LN1(x) for one (row-tile, head) step."""
    @pl.when(pl.program_id(2) == 0)
    def _():
        h_scr[...] = _layernorm(x_ref[0], ln1w_ref[0], ln1b_ref[0]).astype(jnp.bfloat16)

    y = jnp.dot(h_scr[...], w_ref[0],
                preferred_element_type=jnp.float32) + b_ref[0, 0]
    o_ref[0, 0] = y.astype(jnp.bfloat16)      # scale already folded into Wq/bq


def flash_attn_kernel(q_ref, k_ref, v_ref, o_ref, m_scr, l_scr, acc_scr):
    """Online-softmax attention for one (batch, head, q-tile) over kv tiles."""
    ki = pl.program_id(3)

    @pl.when(ki == 0)
    def _():
        m_scr[...] = jnp.full_like(m_scr, -jnp.inf)
        l_scr[...] = jnp.zeros_like(l_scr)
        acc_scr[...] = jnp.zeros_like(acc_scr)

    q = q_ref[0, 0]                            # (tq, hd) bf16, pre-scaled
    k = k_ref[0, 0]                            # (tk, hd) bf16
    v = v_ref[0, 0]                            # (tk, hd) bf16

    s = jax.lax.dot_general(q, k, (((1,), (1,)), ((), ())),
                            preferred_element_type=jnp.float32)   # (tq, tk)
    m_prev = m_scr[...]
    m_new = jnp.maximum(m_prev, jnp.max(s, axis=-1, keepdims=True))
    alpha = jnp.exp(m_prev - m_new)
    p = jnp.exp(s - m_new)
    l_scr[...] = alpha * l_scr[...] + jnp.sum(p, axis=-1, keepdims=True)
    acc_scr[...] = alpha * acc_scr[...] + jnp.dot(
        p.astype(jnp.bfloat16), v, preferred_element_type=jnp.float32)
    m_scr[...] = m_new

    @pl.when(ki == pl.num_programs(3) - 1)
    def _():
        o_ref[0] = (acc_scr[...] *
                    pl.reciprocal(l_scr[...], approx=True)).astype(o_ref.dtype)


def proj_mlp_kernel(x_ref, attn_ref, wo_ref, bo_ref, ln2w_ref, ln2b_ref,
                    w1_ref, b1_ref, w2_ref, b2_ref, o_ref,
                    xr_scr, h_scr, acc_scr):
    """y = xr + W2(GELU(W1(LN2(xr)))),  xr = x + attn @ Wo + bo.

    Fuses the attention output projection, first residual, LN2 and the MLP
    for one row tile; the intermediate dim I is tiled (grid axis 1)."""
    it = pl.program_id(1)

    @pl.when(it == 0)
    def _():
        proj = jnp.dot(attn_ref[...], wo_ref[...],
                       preferred_element_type=jnp.float32) + bo_ref[0]
        xr = x_ref[...] + proj
        xr_scr[...] = xr
        h_scr[...] = _layernorm(xr, ln2w_ref[0], ln2b_ref[0]).astype(jnp.bfloat16)
        acc_scr[...] = jnp.zeros_like(acc_scr)

    m = jnp.dot(h_scr[...], w1_ref[...],
                preferred_element_type=jnp.float32) + b1_ref[0]
    m = jax.nn.gelu(m, approximate=False)         # exact erf GELU (nn.GELU())
    acc_scr[...] += jnp.dot(m.astype(jnp.bfloat16), w2_ref[...],
                            preferred_element_type=jnp.float32)

    @pl.when(it == pl.num_programs(1) - 1)
    def _():
        o_ref[...] = xr_scr[...] + acc_scr[...] + b2_ref[0]


def lm_head_kernel(x_ref, lnw_ref, lnb_ref, wh_ref, o_ref, h_scr):
    """Final LN (once per row tile, at vocab-tile 0) + tiled LM head matmul."""
    @pl.when(pl.program_id(1) == 0)
    def _():
        h_scr[...] = _layernorm(x_ref[...], lnw_ref[0], lnb_ref[0]).astype(jnp.bfloat16)

    o_ref[...] = jnp.dot(h_scr[...], wh_ref[...],
                         preferred_element_type=jnp.float32)


# ----------------------------- wrappers --------------------------------------


def run_qkv_proj(x, blk, *, num_heads, row_tile=None):
    B, T, H = x.shape
    nh = num_heads
    hd = H // nh
    tt = row_tile if row_tile is not None else _pick_tile(T, _ROW_TILE_TARGET, 8)
    return pl.pallas_call(
        qkv_proj_kernel,
        out_shape=jax.ShapeDtypeStruct((3 * nh, B, T, hd), jnp.bfloat16),
        grid=(B, T // tt, 3 * nh),
        in_specs=[
            pl.BlockSpec((1, tt, H), lambda b, t, c: (b, t, 0)),
            pl.BlockSpec((1, H), lambda b, t, c: (0, 0)),
            pl.BlockSpec((1, H), lambda b, t, c: (0, 0)),
            pl.BlockSpec((1, H, hd), lambda b, t, c: (c, 0, 0)),   # streamed per head
            pl.BlockSpec((1, 1, hd), lambda b, t, c: (c, 0, 0)),
        ],
        out_specs=pl.BlockSpec((1, 1, tt, hd), lambda b, t, c: (c, b, t, 0)),
        scratch_shapes=[pltpu.VMEM((tt, H), jnp.bfloat16)],
        compiler_params=pltpu.CompilerParams(
            dimension_semantics=("parallel", "parallel", "arbitrary"),
            vmem_limit_bytes=_vmem_limit_bytes()),
    )(x, blk["ln1_w"], blk["ln1_b"], blk["wqkv_h"], blk["bqkv_h"])


def run_flash_attention(qkvh, *, num_heads, q_tile=None, kv_tile=None):
    three_nh, B, T, hd = qkvh.shape
    nh = num_heads
    assert three_nh == 3 * nh
    H = nh * hd
    tq = q_tile if q_tile is not None else _pick_tile(T, 256, 8)
    tk = kv_tile if kv_tile is not None else _pick_tile(T, 512, 8)

    def q_map(b, h, qi, ki):
        return (h, b, qi, 0)

    def k_map(b, h, qi, ki):
        return (nh + h, b, ki, 0)

    def v_map(b, h, qi, ki):
        return (2 * nh + h, b, ki, 0)

    return pl.pallas_call(
        flash_attn_kernel,
        out_shape=jax.ShapeDtypeStruct((B, T, H), jnp.bfloat16),
        grid=(B, nh, T // tq, T // tk),
        in_specs=[
            pl.BlockSpec((1, 1, tq, hd), q_map),
            pl.BlockSpec((1, 1, tk, hd), k_map),
            pl.BlockSpec((1, 1, tk, hd), v_map),
        ],
        out_specs=pl.BlockSpec((1, tq, hd), lambda b, h, qi, ki: (b, qi, h)),
        scratch_shapes=[pltpu.VMEM((tq, 1), jnp.float32),
                        pltpu.VMEM((tq, 1), jnp.float32),
                        pltpu.VMEM((tq, hd), jnp.float32)],
        compiler_params=pltpu.CompilerParams(
            dimension_semantics=("parallel", "parallel", "parallel", "arbitrary"),
            vmem_limit_bytes=_vmem_limit_bytes()),
    )(qkvh, qkvh, qkvh)


def run_proj_mlp(x, attn, blk, *, row_tile=None, i_tile=None):
    B, T, H = x.shape
    I = blk["w1"].shape[1]
    R = B * T
    tm = row_tile if row_tile is not None else _pick_tile(R, _ROW_TILE_TARGET, 8)
    # Double-buffered w1 (H,ti) + w2 (ti,H) bf16 tiles cost 8*H*ti bytes.
    ti = i_tile if i_tile is not None else _budget_tile(I, 8 * H, 256)
    x2 = x.reshape(R, H)
    a2 = attn.reshape(R, H)
    out = pl.pallas_call(
        proj_mlp_kernel,
        out_shape=jax.ShapeDtypeStruct((R, H), jnp.float32),
        grid=(R // tm, I // ti),
        in_specs=[
            pl.BlockSpec((tm, H), lambda r, i: (r, 0)),   # x (f32 residual)
            pl.BlockSpec((tm, H), lambda r, i: (r, 0)),   # attn (bf16)
            pl.BlockSpec((H, H), lambda r, i: (0, 0)),    # wo (resident)
            pl.BlockSpec((1, H), lambda r, i: (0, 0)),
            pl.BlockSpec((1, H), lambda r, i: (0, 0)),
            pl.BlockSpec((1, H), lambda r, i: (0, 0)),
            pl.BlockSpec((H, ti), lambda r, i: (0, i)),   # w1 streamed
            pl.BlockSpec((1, ti), lambda r, i: (0, i)),
            pl.BlockSpec((ti, H), lambda r, i: (i, 0)),   # w2 streamed
            pl.BlockSpec((1, H), lambda r, i: (0, 0)),
        ],
        out_specs=pl.BlockSpec((tm, H), lambda r, i: (r, 0)),
        scratch_shapes=[pltpu.VMEM((tm, H), jnp.float32),    # xr
                        pltpu.VMEM((tm, H), jnp.bfloat16),   # LN2(xr)
                        pltpu.VMEM((tm, H), jnp.float32)],   # MLP accumulator
        compiler_params=pltpu.CompilerParams(
            dimension_semantics=("parallel", "arbitrary"),
            vmem_limit_bytes=_vmem_limit_bytes()),
    )(x2, a2, blk["wo"], blk["bo"], blk["ln2_w"], blk["ln2_b"],
      blk["w1"], blk["b1"], blk["w2"], blk["b2"])
    return out.reshape(B, T, H)


def run_head(x, lnf_w, lnf_b, head_w, *, row_tile=None, v_tile=None):
    B, T, H = x.shape
    V = head_w.shape[1]
    R = B * T
    tm = row_tile if row_tile is not None else _pick_tile(R, _ROW_TILE_TARGET, 8)
    # Double-buffered (H,tv) bf16 weight + (tm,tv) f32 output tiles.
    tv = v_tile if v_tile is not None else _budget_tile(V, 4 * H + 8 * tm, 256)
    x2 = x.reshape(R, H)
    out = pl.pallas_call(
        lm_head_kernel,
        out_shape=jax.ShapeDtypeStruct((R, V), jnp.float32),
        grid=(R // tm, V // tv),
        in_specs=[
            pl.BlockSpec((tm, H), lambda r, v: (r, 0)),
            pl.BlockSpec((1, H), lambda r, v: (0, 0)),
            pl.BlockSpec((1, H), lambda r, v: (0, 0)),
            pl.BlockSpec((H, tv), lambda r, v: (0, v)),
        ],
        out_specs=pl.BlockSpec((tm, tv), lambda r, v: (r, v)),
        scratch_shapes=[pltpu.VMEM((tm, H), jnp.bfloat16)],
        compiler_params=pltpu.CompilerParams(
            dimension_semantics=("parallel", "arbitrary"),
            vmem_limit_bytes=_vmem_limit_bytes()),
    )(x2, lnf_w, lnf_b, head_w)
    return out.reshape(B, T, V)


# ----------------------------- parameter prep --------------------------------


def prepare_params(params, *, num_heads):
    """Convert logical f32 params into the kernel-ready layout (done once):
    per-head fused QKV weights with 1/sqrt(hd) folded into Q, bf16 matmul
    weights, (1, X) biases / LN params."""
    bf = jnp.bfloat16
    H = params["tok_emb"].shape[1]
    hd = H // num_heads
    scale = 1.0 / (hd ** 0.5)
    prepped = {
        "tok_emb": params["tok_emb"],
        "pos_emb": params["pos_emb"],
        "lnf_w": params["lnf_w"].reshape(1, H),
        "lnf_b": params["lnf_b"].reshape(1, H),
        "head_w": params["head_w"].astype(bf),
        "blocks": [],
    }
    for blk in params["blocks"]:
        w = jnp.concatenate([blk["wq"] * scale, blk["wk"], blk["wv"]], axis=1)  # (H,3H)
        b = jnp.concatenate([blk["bq"] * scale, blk["bk"], blk["bv"]], axis=0)  # (3H,)
        wqkv_h = w.reshape(H, 3 * num_heads, hd).transpose(1, 0, 2).astype(bf)  # (3nh,H,hd)
        bqkv_h = b.reshape(3 * num_heads, 1, hd)                                 # (3nh,1,hd)
        I = blk["w1"].shape[1]
        prepped["blocks"].append({
            "ln1_w": blk["ln1_w"].reshape(1, H), "ln1_b": blk["ln1_b"].reshape(1, H),
            "wqkv_h": wqkv_h, "bqkv_h": bqkv_h,
            "wo": blk["wo"].astype(bf), "bo": blk["bo"].reshape(1, H),
            "ln2_w": blk["ln2_w"].reshape(1, H), "ln2_b": blk["ln2_b"].reshape(1, H),
            "w1": blk["w1"].astype(bf), "b1": blk["b1"].reshape(1, I),
            "w2": blk["w2"].astype(bf), "b2": blk["b2"].reshape(1, H),
        })
    return prepped


def gpt_forward(input_ids, params, *, num_heads, row_tile=None, i_tile=None,
                v_tile=None, q_tile=None, kv_tile=None, proj_row_tile=None):
    kp = prepare_params(params, num_heads=num_heads)   # in production: prep once
    B, T = input_ids.shape
    tok = jnp.take(kp["tok_emb"], input_ids, axis=0)   # embedding gather (glue)
    pos = kp["pos_emb"][:T][None, :, :]
    x = tok + pos                                      # dropout p -> identity (eval)
    for blk in kp["blocks"]:
        qkvh = run_qkv_proj(x, blk, num_heads=num_heads, row_tile=proj_row_tile)
        attn = run_flash_attention(qkvh, num_heads=num_heads,
                                   q_tile=q_tile, kv_tile=kv_tile)
        x = run_proj_mlp(x, attn, blk, row_tile=row_tile, i_tile=i_tile)
    logits = run_head(x, kp["lnf_w"], kp["lnf_b"], kp["head_w"],
                      row_tile=row_tile, v_tile=v_tile)
    return {"logits": logits}


# ----------------------------- parameter init --------------------------------


def init_params(key, *, vocab_size, hidden_size, intermediate_size,
                max_position_embeddings, num_layers):
    H, I, V = hidden_size, intermediate_size, vocab_size

    def nrm(k, shape):
        return 0.02 * jax.random.normal(k, shape, dtype=jnp.float32)

    keys = jax.random.split(key, 3 + num_layers)
    params = {
        "tok_emb": nrm(keys[0], (V, H)),
        "pos_emb": nrm(keys[1], (max_position_embeddings, H)),
        "head_w": nrm(keys[2], (H, V)),                 # [in, out] layout
        "lnf_w": jnp.ones((H,), jnp.float32),
        "lnf_b": jnp.zeros((H,), jnp.float32),
        "blocks": [],
    }
    for layer in range(num_layers):
        ks = jax.random.split(keys[3 + layer], 6)
        params["blocks"].append({
            "ln1_w": jnp.ones((H,), jnp.float32), "ln1_b": jnp.zeros((H,), jnp.float32),
            "wq": nrm(ks[0], (H, H)), "bq": jnp.zeros((H,), jnp.float32),
            "wk": nrm(ks[1], (H, H)), "bk": jnp.zeros((H,), jnp.float32),
            "wv": nrm(ks[2], (H, H)), "bv": jnp.zeros((H,), jnp.float32),
            "wo": nrm(ks[3], (H, H)), "bo": jnp.zeros((H,), jnp.float32),
            "ln2_w": jnp.ones((H,), jnp.float32), "ln2_b": jnp.zeros((H,), jnp.float32),
            "w1": nrm(ks[4], (H, I)), "b1": jnp.zeros((I,), jnp.float32),
            "w2": nrm(ks[5], (I, H)), "b2": jnp.zeros((H,), jnp.float32),
        })
    return params


# ----------------------------- pure-JAX reference ----------------------------


def gpt_forward_ref(input_ids, params, *, num_heads):
    """PyTorch-faithful reference (explicit score scaling, plain softmax),
    with the same bf16-operand / f32-accumulate matmul recipe."""
    bf = jnp.bfloat16
    B, T = input_ids.shape
    x = jnp.take(params["tok_emb"], input_ids, axis=0) + params["pos_emb"][:T][None]
    H = x.shape[-1]
    hd = H // num_heads

    def lin(h, w, b):
        return jnp.einsum("bth,ho->bto", h.astype(bf), w.astype(bf),
                          preferred_element_type=jnp.float32) + b

    for blk in params["blocks"]:
        h1 = _layernorm(x, blk["ln1_w"], blk["ln1_b"])
        q = lin(h1, blk["wq"], blk["bq"])
        k = lin(h1, blk["wk"], blk["bk"])
        v = lin(h1, blk["wv"], blk["bv"])

        def split(z):
            return z.reshape(B, T, num_heads, hd).transpose(0, 2, 1, 3)

        q, k, v = split(q), split(k), split(v)
        s = jnp.einsum("bhtd,bhsd->bhts", q.astype(bf), k.astype(bf),
                       preferred_element_type=jnp.float32) / jnp.sqrt(jnp.float32(hd))
        p = jax.nn.softmax(s, axis=-1)
        a = jnp.einsum("bhts,bhsd->bhtd", p.astype(bf), v.astype(bf),
                       preferred_element_type=jnp.float32)
        a = a.transpose(0, 2, 1, 3).reshape(B, T, H)
        x = x + lin(a, blk["wo"], blk["bo"])

        h2 = _layernorm(x, blk["ln2_w"], blk["ln2_b"])
        m = lin(h2, blk["w1"], blk["b1"])
        m = jax.nn.gelu(m, approximate=False)
        x = x + lin(m, blk["w2"], blk["b2"])

    h = _layernorm(x, params["lnf_w"], params["lnf_b"])
    return jnp.einsum("bth,hv->btv", h.astype(bf), params["head_w"].astype(bf),
                      preferred_element_type=jnp.float32)


# ----------------------------- main ------------------------------------------

if __name__ == "__main__":
    VOCAB = 512
    HIDDEN = 256
    NUM_HEADS = 2          # head_dim = 128 (lane-aligned)
    NUM_LAYERS = 2
    INTERMEDIATE = 512
    MAX_POS = 64
    BATCH, SEQ = 2, 64

    key = jax.random.PRNGKey(0)
    pkey, dkey = jax.random.split(key)
    params = init_params(
        pkey,
        vocab_size=VOCAB,
        hidden_size=HIDDEN,
        intermediate_size=INTERMEDIATE,
        max_position_embeddings=MAX_POS,
        num_layers=NUM_LAYERS,
    )
    input_ids = jax.random.randint(dkey, (BATCH, SEQ), 0, VOCAB, dtype=jnp.int32)

    # Small explicit tiles so the multi-tile paths (per-head QKV streaming,
    # online-softmax kv tiling, I-accumulator, row / vocab tiling) are all
    # exercised at this toy size.
    out = gpt_forward(input_ids, params, num_heads=NUM_HEADS,
                      row_tile=64, i_tile=256, v_tile=256,
                      q_tile=32, kv_tile=32, proj_row_tile=32)
    logits = jax.block_until_ready(out["logits"])
    assert logits.shape == (BATCH, SEQ, VOCAB)

    ref = jax.block_until_ready(gpt_forward_ref(input_ids, params, num_heads=NUM_HEADS))
    max_err = float(jnp.max(jnp.abs(logits - ref)))
    assert jnp.allclose(logits, ref, atol=1e-2, rtol=1e-2), (
        f"Pallas output mismatch vs reference (max abs err {max_err})")

    print("KERNEL_OK")
</pallas_src>

<mosaic_0001>
module attributes {stable_mosaic.version = 11 : i64} {
  func.func @qkv_proj_kernel(%arg0: i32, %arg1: i32, %arg2: i32, %arg3: memref<1x32x256xf32, #tpu.memory_space<vmem>>, %arg4: memref<1x256xf32, #tpu.memory_space<vmem>>, %arg5: memref<1x256xf32, #tpu.memory_space<vmem>>, %arg6: memref<1x256x128xbf16, #tpu.memory_space<vmem>>, %arg7: memref<1x1x128xf32, #tpu.memory_space<vmem>>, %arg8: memref<1x1x32x128xbf16, #tpu.memory_space<vmem>>, %arg9: memref<32x256xbf16, #tpu.memory_space<vmem>>) attributes {dimension_semantics = [#tpu.dimension_semantics<parallel>, #tpu.dimension_semantics<parallel>, #tpu.dimension_semantics<arbitrary>], iteration_bounds = array<i64: 2, 2, 6>, scalar_prefetch = 0 : i64, scratch_operands = 1 : i64, tpu.core_type = #tpu.core_type<tc>, window_params = [{transform_indices = @transform_0, window_bounds = array<i64: 1, 32, 256>}, {pipeline_mode = #tpu.pipeline_mode<synchronous>, transform_indices = @transform_1, window_bounds = array<i64: 1, 256>}, {pipeline_mode = #tpu.pipeline_mode<synchronous>, transform_indices = @transform_2, window_bounds = array<i64: 1, 256>}, {transform_indices = @transform_3, window_bounds = array<i64: 1, 256, 128>}, {transform_indices = @transform_4, window_bounds = array<i64: 1, 1, 128>}, {transform_indices = @transform_5, window_bounds = array<i64: 1, 1, 32, 128>}]} {
    %c0_i32 = arith.constant 0 : i32
    %0 = arith.cmpi eq, %arg2, %c0_i32 : i32
    %1 = arith.extui %0 : i1 to i32
    %c0_i32_0 = arith.constant 0 : i32
    %2 = arith.cmpi ne, %1, %c0_i32_0 : i32
    scf.if %2 {
      %c0_12 = arith.constant 0 : index
      %c0_13 = arith.constant 0 : index
      %c0_14 = arith.constant 0 : index
      %16 = vector.load %arg3[%c0_12, %c0_13, %c0_14] : memref<1x32x256xf32, #tpu.memory_space<vmem>>, vector<1x32x256xf32>
      %17 = vector.shape_cast %16 : vector<1x32x256xf32> to vector<32x256xf32>
      %c0_15 = arith.constant 0 : index
      %c0_16 = arith.constant 0 : index
      %18 = vector.load %arg4[%c0_15, %c0_16] : memref<1x256xf32, #tpu.memory_space<vmem>>, vector<1x256xf32>
      %19 = vector.shape_cast %18 : vector<1x256xf32> to vector<256xf32>
      %c0_17 = arith.constant 0 : index
      %c0_18 = arith.constant 0 : index
      %20 = vector.load %arg5[%c0_17, %c0_18] : memref<1x256xf32, #tpu.memory_space<vmem>>, vector<1x256xf32>
      %21 = vector.shape_cast %20 : vector<1x256xf32> to vector<256xf32>
      %cst_19 = arith.constant dense<0.000000e+00> : vector<32xf32>
      %22 = vector.multi_reduction <add>, %17, %cst_19 [1] : vector<32x256xf32> to vector<32xf32>
      %23 = vector.shape_cast %22 : vector<32xf32> to vector<32x1xf32>
      %cst_20 = arith.constant 2.560000e+02 : f32
      %24 = vector.broadcast %cst_20 : f32 to vector<32x1xf32>
      %25 = arith.divf %23, %24 : vector<32x1xf32>
      %26 = vector.broadcast %25 : vector<32x1xf32> to vector<32x256xf32>
      %27 = arith.subf %17, %26 : vector<32x256xf32>
      %28 = arith.mulf %27, %27 : vector<32x256xf32>
      %cst_21 = arith.constant dense<0.000000e+00> : vector<32xf32>
      %29 = vector.multi_reduction <add>, %28, %cst_21 [1] : vector<32x256xf32> to vector<32xf32>
      %30 = vector.shape_cast %29 : vector<32xf32> to vector<32x1xf32>
      %cst_22 = arith.constant 2.560000e+02 : f32
      %31 = vector.broadcast %cst_22 : f32 to vector<32x1xf32>
      %32 = arith.divf %30, %31 : vector<32x1xf32>
      %33 = vector.broadcast %25 : vector<32x1xf32> to vector<32x256xf32>
      %34 = arith.subf %17, %33 : vector<32x256xf32>
      %cst_23 = arith.constant 9.99999974E-6 : f32
      %35 = vector.broadcast %cst_23 : f32 to vector<32x1xf32>
      %36 = arith.addf %32, %35 : vector<32x1xf32>
      %37 = math.rsqrt %36 : vector<32x1xf32>
      %38 = vector.broadcast %37 : vector<32x1xf32> to vector<32x256xf32>
      %39 = arith.mulf %34, %38 : vector<32x256xf32>
      %40 = vector.shape_cast %19 : vector<256xf32> to vector<1x256xf32>
      %41 = vector.broadcast %40 : vector<1x256xf32> to vector<32x256xf32>
      %42 = arith.mulf %39, %41 : vector<32x256xf32>
      %43 = vector.shape_cast %21 : vector<256xf32> to vector<1x256xf32>
      %44 = vector.broadcast %43 : vector<1x256xf32> to vector<32x256xf32>
      %45 = arith.addf %42, %44 : vector<32x256xf32>
      %46 = arith.truncf %45 : vector<32x256xf32> to vector<32x256xbf16>
      %c0_24 = arith.constant 0 : index
      %c0_25 = arith.constant 0 : index
      %47 = vector.load %arg9[%c0_24, %c0_25] : memref<32x256xbf16, #tpu.memory_space<vmem>>, vector<32x256xbf16>
      tpu.vector_store %arg9[%c0_24, %c0_25], %46 {strides = array<i32>} : memref<32x256xbf16, #tpu.memory_space<vmem>>, vector<32x256xbf16>,
    } else {
    }
    %c0 = arith.constant 0 : index
    %c0_1 = arith.constant 0 : index
    %3 = vector.load %arg9[%c0, %c0_1] : memref<32x256xbf16, #tpu.memory_space<vmem>>, vector<32x256xbf16>
    %c0_2 = arith.constant 0 : index
    %c0_3 = arith.constant 0 : index
    %c0_4 = arith.constant 0 : index
    %4 = vector.load %arg6[%c0_2, %c0_3, %c0_4] : memref<1x256x128xbf16, #tpu.memory_space<vmem>>, vector<1x256x128xbf16>
    %5 = vector.shape_cast %4 : vector<1x256x128xbf16> to vector<256x128xbf16>
    %cst = arith.constant dense<0.000000e+00> : vector<32x128xf32>
    %6 = tpu.matmul %3, %5, %cst {dimension_numbers = #tpu.dot_dimension_numbers<[1], [0], [0], [1], [0, 0, 1, 1], [], []>} : vector<32x256xbf16>, vector<256x128xbf16>, vector<32x128xf32> -> vector<32x128xf32>
    %c0_5 = arith.constant 0 : index
    %c0_6 = arith.constant 0 : index
    %c0_7 = arith.constant 0 : index
    %7 = vector.load %arg7[%c0_5, %c0_6, %c0_7] : memref<1x1x128xf32, #tpu.memory_space<vmem>>, vector<1x1x128xf32>
    %8 = vector.shape_cast %7 : vector<1x1x128xf32> to vector<128xf32>
    %9 = vector.shape_cast %8 : vector<128xf32> to vector<1x128xf32>
    %10 = vector.broadcast %9 : vector<1x128xf32> to vector<32x128xf32>
    %11 = arith.addf %6, %10 : vector<32x128xf32>
    %12 = arith.truncf %11 : vector<32x128xf32> to vector<32x128xbf16>
    %c0_8 = arith.constant 0 : index
    %c0_9 = arith.constant 0 : index
    %c0_10 = arith.constant 0 : index
    %c0_11 = arith.constant 0 : index
    %13 = vector.load %arg8[%c0_8, %c0_9, %c0_10, %c0_11] : memref<1x1x32x128xbf16, #tpu.memory_space<vmem>>, vector<1x1x32x128xbf16>
    %14 = vector.shape_cast %13 : vector<1x1x32x128xbf16> to vector<32x128xbf16>
    %15 = vector.shape_cast %12 : vector<32x128xbf16> to vector<1x1x32x128xbf16>
    tpu.vector_store %arg8[%c0_8, %c0_9, %c0_10, %c0_11], %15 {strides = array<i32>} : memref<1x1x32x128xbf16, #tpu.memory_space<vmem>>, vector<1x1x32x128xbf16>,
    return
  }
  func.func @transform_0(%arg0: i32, %arg1: i32, %arg2: i32) -> (i32, i32, i32) {
    %c0_i32 = arith.constant 0 : i32
    %c0_i32_0 = arith.constant 0 : i32
    return %arg0, %arg1, %c0_i32 : i32, i32, i32
  }
  func.func @transform_1(%arg0: i32, %arg1: i32, %arg2: i32) -> (i32, i32) {
    %c0_i32 = arith.constant 0 : i32
    %c0_i32_0 = arith.constant 0 : i32
    %c0_i32_1 = arith.constant 0 : i32
    return %c0_i32, %c0_i32_0 : i32, i32
  }
  func.func @transform_2(%arg0: i32, %arg1: i32, %arg2: i32) -> (i32, i32) {
    %c0_i32 = arith.constant 0 : i32
    %c0_i32_0 = arith.constant 0 : i32
    %c0_i32_1 = arith.constant 0 : i32
    return %c0_i32, %c0_i32_0 : i32, i32
  }
  func.func @transform_3(%arg0: i32, %arg1: i32, %arg2: i32) -> (i32, i32, i32) {
    %c0_i32 = arith.constant 0 : i32
    %c0_i32_0 = arith.constant 0 : i32
    %c0_i32_1 = arith.constant 0 : i32
    return %arg2, %c0_i32, %c0_i32_0 : i32, i32, i32
  }
  func.func @transform_4(%arg0: i32, %arg1: i32, %arg2: i32) -> (i32, i32, i32) {
    %c0_i32 = arith.constant 0 : i32
    %c0_i32_0 = arith.constant 0 : i32
    %c0_i32_1 = arith.constant 0 : i32
    return %arg2, %c0_i32, %c0_i32_0 : i32, i32, i32
  }
  func.func @transform_5(%arg0: i32, %arg1: i32, %arg2: i32) -> (i32, i32, i32, i32) {
    %c0_i32 = arith.constant 0 : i32
    %c0_i32_0 = arith.constant 0 : i32
    return %arg2, %arg0, %arg1, %c0_i32 : i32, i32, i32, i32
  }
}

</mosaic_0001>

<bundles_post_ra>
// kernel: tpu_custom_call.1
= control target key start
LH: loop header
LB: loop body
LE: loop exit
PB: predicated region body
PF: predicated region fallthrough
CT: control target
= control target key end

     0   :  { %s1778_s0 = inlined_call_operand.hbm [shape: f32[2,64,256], index: 0, kind: input, shape index: {}]   ;;  %s1779_s1 = inlined_call_operand.vmem [shape: f32[1,256], index: 1, kind: input, shape index: {}]   ;;  %s1780_s2 = inlined_call_operand.vmem [shape: f32[1,256], index: 2, kind: input, shape index: {}]   ;;  %s1781_s3 = inlined_call_operand.hbm [shape: bf16[6,256,128], index: 3, kind: input, shape index: {}]   ;;  %s1782_s4 = inlined_call_operand.vmem [shape: f32[6,1,128], index: 4, kind: input, shape index: {}]   ;;  %s1783_s5 = inlined_call_operand.hbm [shape: bf16[6,2,64,128], index: 5, kind: output, shape index: {}]  }
   0x1   :  { %1798 = sst [smem:[#allocation22_spill]] %s1778_s0 }
   0x2   :  { %1799 = sst [smem:[#allocation23_spill]] %s1779_s1 }
   0x3   :  { %1800 = sst [smem:[#allocation24_spill]] %s1780_s2 }
   0x4   :  { %1801 = sst [smem:[#allocation25_spill]] %s1782_s4 }
   0x5   :  { %1802 = sst [smem:[#allocation26_spill]] %s1783_s5 }
   0x6   :  { %10 = vsyncpa [#allocation4], 0 }
   0x7   :  { %12 = vsyncpa [#allocation4 + $0x1], 0 }
   0x8   :  { %13 = vsyncpa [#allocation7], 0 }
   0x9   :  { %15 = vsyncpa [#allocation7 + $0x1], 0 }
   0xa   :  { %16 = vsyncpa [#allocation5], 0 }
   0xb   :  { %18 = vsyncpa [#allocation5 + $0x1], 0  ;;  %s1359_s18 = smov 0   ;;  %s1361_s19 = smov 0  }
   0xc   :  { %s1363_s20 = smov 0   ;;  %s1365_s21 = smov 0  }
   0xd   :  { %s1367_s22 = smov 0   ;;  %s1369_s23 = smov 0  }
   0xe   :  { %s1371_s24 = smov 0   ;;  %s1373_s25 = smov 0  }
   0xf   :  { %s1375_s26 = smov 0   ;;  %s1377_s27 = smov 0  }
  0x10   :  { %s1379_s28 = smov 0   ;;  %s1381_s29 = smov 0  }
  0x11   :  { %s1383_s30 = smov 0   ;;  %s1385_s6 = smov 0  }
  0x12   :  { %s1387_s7 = smov 0   ;;  %s1389_s8 = smov 0  }
  0x13 LB: > { %1803 = sst [smem:[#allocation12_spill]] %s1258_s18  ;;  %s809_s9 = sadd.s32 4294967295, %s1318_s8   ;;  %s1318_s8 = sphi %s1389_s8, %s24_s8   ;;  %s1314_s7 = sphi %s1387_s7, %s1864_s7   ;;  %s1310_s6 = sphi %s1385_s6, %s1850_s6   ;;  %s1306_s30 = sphi %s1383_s30, %s1863_s30   ;;  %s1302_s29 = sphi %s1381_s29, %s1862_s29   ;;  %s1298_s28 = sphi %s1379_s28, %s1848_s28   ;;  %s1294_s27 = sphi %s1377_s27, %s1861_s27   ;;  %s1290_s26 = sphi %s1375_s26, %s1860_s26   ;;  %s1286_s25 = sphi %s1373_s25, %s1859_s25   ;;  %s1282_s24 = sphi %s1371_s24, %s1858_s24   ;;  %s1278_s23 = sphi %s1369_s23, %s1857_s23   ;;  %s1274_s22 = sphi %s1367_s22, %s1856_s22   ;;  %s1270_s21 = sphi %s1365_s21, %s1855_s21   ;;  %s1266_s20 = sphi %s1363_s20, %s1854_s20   ;;  %s1262_s19 = sphi %s1361_s19, %s1853_s19   ;;  %s1258_s18 = sphi %s1359_s18, %s1852_s18  }
  0x14   : > { %1804 = sst [smem:[#allocation13_spill]] %s1294_s27  ;;  %p59_p0 = scmp.ne.s32.totalorder %s1290_s26, %s1286_s25 }
  0x15   : > { %1805 = sst [smem:[#allocation14_spill]] %s1298_s28  ;;  %p1786_p1 = scmp.eq.s32.totalorder %s1318_s8, 0 }
  0x16   : > { %1806 = sst [smem:[#allocation15_spill]] %s1302_s29  ;;  %p65_p2 = scmp.ne.s32.totalorder %s1286_s25, %s1282_s24 }
  0x17   : > { %1807 = sst [smem:[#allocation16_spill]] %s1310_s6  ;;  %p1445_p3 = scmp.eq.s32.totalorder %s809_s9, 0 }
  0x18   : > { %p1451_p4 = por %p1786_p1, %p59_p0  ;;  %p1455_p5 = scmp.eq.s32.totalorder %s809_s9, 23 }
  0x19   : > { %p1461_p6 = por %p1445_p3, %p65_p2  ;;  %p1785_p7 = scmp.lt.s32.totalorder %s1318_s8, 24 }
  0x1a   : > { %s1810_s15 = scalar_select %p1455_p5, 1, 0 }
  0x1b   : > { %s1811_s16 = scalar_select %p1461_p6, 1, 0 }
  0x1c   : > { %s219_s17 = sand.u32 1, %s1290_s26   ;;  %s854_s12 = sshll.u32 %s1310_s6, 3 }
  0x1d   : > { %s813_s24 = sshll.u32 %s219_s17, 6  ;;  %s816_s11 = sshll.u32 %s1314_s7, 4 }
  0x1e   : > { %s223_s10 = scalar_lea.vmem [#allocation3], %s813_s24  ;;  %s230_s29 = sadd.s32 %s854_s12, %s816_s11 }
  0x1f   : > { %s233_s5 = sshll.u32 %s223_s10, 4  ;;  %s817_s28 = sshll.u32 %s230_s29, 7  ;;  %s1469_s5 = int_to_ptr.vmem [resolvable:$true] %s233_s5 }
  0x20   : > { %p1475_p8 = pnand %p1785_p7, %p1451_p4  ;;  %s1813_s0 = sld [smem:[#allocation22_spill]] }
  0x21   : > { %s1484_s10 = scalar_lea.sflag [#allocation4], %s219_s17 }
  0x22   : > { %p1094_p10 = pneg %p1475_p8 }
  0x26   : > { %s1482_s4 = scalar_lea.hbm %s1813_s0, %s817_s28  ;;  %s1097_s2 = scalar_lea.hbm %s1813_s0, 4096 }
  0x27   : > { %s1092_s29 = scalar_lea.hbm %s1482_s4, 1024  ;;  %p1098_p13 = scmp.lt.u32.totalorder %s1482_s4, %s1813_s0 }
  0x28   : > { %p1093_p9 = scmp.ne.s32.totalorder %s1482_s4, %s1092_s29  ;;  %p1099_p0 = scmp.lt.u32.totalorder %s1097_s2, %s1092_s29 }
  0x29   : > { %p1101_p4 = scmp.lt.u32.totalorder %s1092_s29, %s1482_s4 }
  0x2a   : > { %p1095_p11 = pnand %p1094_p10, %p1093_p9  ;;  %p1100_p2 = por %p1099_p0, %p1098_p13 }
  0x2c   : > { %p1096_p12 = pneg %p1095_p11  ;;  %p1102_p7 = por %p1101_p4, %p1100_p2 }
  0x2e   : > { %p1103_p1 = pnand %p1102_p7, %p1096_p12 }
  0x30   : > { %1106 = shalt.err (!%p1103_p1)
}
  0x31   : > { %s1107_s14 = scalar_lea.vmem %s1469_s5, 1024  ;;  %s1320_s17 = smov [#allocation3]  }
  0x32   : > { %p1108_p9 = scmp.ne.s32.totalorder %s1469_s5, %s1107_s14  ;;  %s1112_s24 = sshll.u32 %s1320_s17, 4  ;;  %s1113_s24 = int_to_ptr.vmem [resolvable:$false] %s1112_s24 }
  0x33   : > { %s1114_s11 = scalar_lea.vmem %s1113_s24, 2048  ;;  %p1115_p5 = scmp.lt.s32.totalorder %s1469_s5, %s1113_s24 }
  0x34   : > { %p1110_p11 = pnand %p1108_p9, %p1094_p10  ;;  %p1116_p13 = scmp.lt.s32.totalorder %s1114_s11, %s1107_s14 }
  0x36   : > { %p1111_p6 = pneg %p1110_p11  ;;  %p1117_p0 = por %p1116_p13, %p1115_p5 }
  0x38   : > { %p1118_p2 = pnand %p1117_p0, %p1111_p6 }
  0x3a   : > { %1121 = shalt.err (!%p1118_p2)
}
  0x3b   : > { %s1321_s29 = smov 256   ;;  %s1322_s1 = smov 16  }
  0x3c   : > { %924 = dma.hbm_to_vmem [thread:$0]  (!%p1475_p8), %s1482_s4, 1024, %s1469_s5, %s1484_s10, %s1321_s29, %s1321_s29, %s1322_s1  }
  0x3d   : > { %p821_p1 = scmp.ge.s32.totalorder %s1318_s8, 1  ;;  %p268_p5 = scmp.lt.s32.totalorder %s1318_s8, 25 }
  0x3e   : > { %s810_s28 = sadd.s32 4294967294, %s1318_s8   ;;  %s36_s12 = sadd.s32 1, %s1306_s30 }
  0x3f   : > { %p1514_p6 = pnand %p821_p1, %p268_p5  ;;  %s120_s14 = sadd.s32 1, %s1278_s23 }
  0x40   : > { %p37_p7 = scmp.ge.s32.totalorder %s36_s12, 6  ;;  %p127_p10 = scmp.ne.s32.totalorder %s1278_s23, %s1274_s22 }
  0x41   : > { %p133_p8 = scmp.ne.s32.totalorder %s1274_s22, %s1270_s21  ;;  %s176_s4 = sadd.s32 1, %s1266_s20 }
  0x42   : > { %s1866_s12 = smov (%p37_p7, %s36_s12), 0  ;;  %s1816_s5 = sadd.s32 1, %s1310_s6 }
  0x43   : > { %1815 = sst [smem:[#allocation17_spill]] %s1866_s12  ;;  %s1868_s5 = smov (!%p37_p7, %s1816_s5), %s1310_s6 }
  0x44   : > { %s117_s9 = ssub.s32 %s1306_s30, %s1866_s12  ;;  %p1817_p12 = scmp.eq.s32.totalorder %s1318_s8, 0 }
  0x45   : > { %p41_p9 = scmp.ge.s32.totalorder %s1868_s5, 2  ;;  %p118_p11 = scmp.eq.s32.totalorder %s117_s9, 0 }
  0x46   : > { %p1535_p4 = por %p127_p10, %p1817_p12  ;;  %p1541_p13 = por %p133_p8, %p1445_p3 }
  0x47   : > { %p186_p0 = scmp.ne.s32.totalorder %s1266_s20, %s1262_s19  ;;  %s1870_s5 = smov (%p41_p9, %s1868_s5), 0 }
  0x48   : > { %s1819_s21 = scalar_select %p1541_p13, 1, 0 }
  0x49   : > { %1820 = sst [smem:[#allocation18_spill]] %s1870_s5  ;;  %s1821_s17 = sadd.s32 1, %s1314_s7 }
  0x4a   : > { %s1872_s17 = smov (!%p41_p9, %s1821_s17), %s1314_s7  ;;  %s48_s24 = ssub.s32 %s1310_s6, %s1870_s5 }
  0x4b   : > { %p1822_p2 = scmp.ne.s32.totalorder %s1810_s15, 0  ;;  %p45_p5 = scmp.ge.s32.totalorder %s1872_s17, 2 }
  0x4c   : > { %p192_p3 = scmp.ne.s32.totalorder %s1262_s19, %s1258_s18  ;;  %p193_p7 = scmp.eq.s32.totalorder %s810_s28, 23 }
  0x4d   : > { %p1556_p1 = por %p1822_p2, %p186_p0  ;;  %s1874_s17 = smov (%p45_p5, %s1872_s17), 0 }
  0x4e   : > { %s1563_s13 = scalar_select %p118_p11, %s1278_s23, %s120_s14  }
  0x4f   : > { %s1823_s11 = scalar_select %p1556_p1, 1, 0 }
  0x50   : > { %1825 = sst [smem:[#allocation20_spill]] %s1563_s13  ;;  %s243_s29 = sand.u32 1, %s1278_s23  }
  0x51   : > { %1824 = sst [smem:[#allocation19_spill]] %s1823_s11  ;;  %s47_s1 = ssub.s32 %s1314_s7, %s1874_s17 }
  0x52   : > { %1826 = sst [smem:[#allocation21_spill]] %s1874_s17  ;;  %s49_s0 = sor.u32 %s48_s24, %s47_s1 }
  0x53   : > { %s171_s15 = sor.u32 %s117_s9, %s47_s1  ;;  %p50_p10 = scmp.eq.s32.totalorder %s49_s0, 0 }
  0x54   : > { %s173_s5 = sor.u32 %s171_s15, %s48_s24  ;;  %p1570_p12 = por %p193_p7, %p192_p3 }
  0x55   : > { %p174_p8 = scmp.eq.s32.totalorder %s173_s5, 0  ;;  %s1828_s6 = sadd.s32 1, %s1290_s26 }
  0x56   : > { %s1827_s12 = scalar_select %p1570_p12, 1, 0 }
  0x57   : > { %s1577_s14 = scalar_select %p50_p10, %s1290_s26, %s1828_s6  }
  0x58   : > { %s1580_s13 = scalar_select %p174_p8, %s1266_s20, %s176_s4  }
  0x59   : > { %s818_s18 = sshll.u32 %s243_s29, 7  ;;  %s855_s28 = sshll.u32 %s1306_s30, 11 }
  0x5a   : > { %s1586_s17 = scalar_lea.hbm %s1781_s3, %s855_s28  ;;  %s247_s0 = scalar_lea.vmem [#allocation6], %s818_s18 }
  0x5b   : > { %s254_s5 = sshll.u32 %s247_s0, 4  ;;  %p1829_p9 = scmp.lt.s32.totalorder %s1318_s8, 24  ;;  %s1596_s5 = int_to_ptr.vmem [resolvable:$true] %s254_s5 }
  0x5c   : > { %s1598_s4 = scalar_lea.sflag [#allocation7], %s243_s29  ;;  %s1122_s27 = scalar_lea.hbm %s1586_s17, 2048 }
  0x5d   : > { %p1592_p11 = pnand %p1829_p9, %p1535_p4  ;;  %p1123_p0 = scmp.ne.s32.totalorder %s1586_s17, %s1122_s27 }
  0x5e   : > { %s1127_s10 = scalar_lea.hbm %s1781_s3, 12288  ;;  %p1128_p4 = scmp.lt.u32.totalorder %s1586_s17, %s1781_s3 }
  0x5f   : > { %p1124_p2 = pneg %p1592_p11  ;;  %p1129_p7 = scmp.lt.u32.totalorder %s1127_s10, %s1122_s27 }
  0x60   : > { %p1131_p8 = scmp.lt.u32.totalorder %s1122_s27, %s1586_s17 }
  0x61   : > { %p1125_p5 = pnand %p1124_p2, %p1123_p0  ;;  %p1130_p10 = por %p1129_p7, %p1128_p4 }
  0x63   : > { %p1126_p3 = pneg %p1125_p5  ;;  %p1132_p9 = por %p1131_p8, %p1130_p10 }
  0x65   : > { %p1133_p12 = pnand %p1132_p9, %p1126_p3 }
  0x67   : > { %1136 = shalt.err (!%p1133_p12)
}
  0x68   : > { %s1137_s29 = scalar_lea.vmem %s1596_s5, 2048  ;;  %s1323_s1 = smov [#allocation6]  }
  0x69   : > { %p1138_p0 = scmp.ne.s32.totalorder %s1596_s5, %s1137_s29  ;;  %s1142_s15 = sshll.u32 %s1323_s1, 4  ;;  %s1143_s15 = int_to_ptr.vmem [resolvable:$false] %s1142_s15 }
  0x6a   : > { %s1144_s28 = scalar_lea.vmem %s1143_s15, 4096  ;;  %p1145_p13 = scmp.lt.s32.totalorder %s1596_s5, %s1143_s15 }
  0x6b   : > { %p1140_p5 = pnand %p1138_p0, %p1124_p2  ;;  %p1146_p4 = scmp.lt.s32.totalorder %s1144_s28, %s1137_s29 }
  0x6d   : > { %p1141_p1 = pneg %p1140_p5  ;;  %p1147_p7 = por %p1146_p4, %p1145_p13 }
  0x6f   : > { %p1148_p10 = pnand %p1147_p7, %p1141_p1 }
  0x71   : > { %1151 = shalt.err (!%p1148_p10)
}
  0x72   : > { %s1324_s0 = smov 64   ;;  %s1325_s27 = smov 4  }
  0x73   : > { %927 = dma.hbm_to_vmem [thread:$0]  (!%p1592_p11), %s1586_s17, 2048, %s1596_s5, %s1598_s4, %s1324_s0, %s1324_s0, %s1325_s27  }
  0x74   : > { %272 = sbr.rel (%p1514_p6) target bundleno = 732 (0x2dc), region = 40  ;;  %s274_s18 = sand.u32 (!%p1514_p6), 1, %s1286_s25  }
  0x75   : > { %s822_s9 = sshll.u32 (!%p1514_p6), %s274_s18, 6  ;;  %s275_s10 = scalar_lea.sflag (!%p1514_p6), [#allocation4], %s274_s18 }
  0x76   : > { %s278_s24 = scalar_lea.vmem (!%p1514_p6), [#allocation3], %s822_s9  ;;  %p1831_p13 = scmp.ne.s32.totalorder (!%p1514_p6), %s1811_s16, 0 }
  0x7b   : > { %1245 = dma.done.wait (%p1831_p13), %s275_s10, 1024  }
  0x7c   : > { %1247 = vsyncadd (%p1831_p13), %s275_s10, 4294966272  ;;  %s283_s11 = sand.u32 1, %s1274_s22   ;;  %p1832_p1 = scmp.ne.s32.totalorder %s1819_s21, 0 }
  0x7d   : > { %s823_s29 = sshll.u32 %s283_s11, 7  ;;  %s284_s6 = scalar_lea.sflag [#allocation7], %s283_s11 }
  0x7e   : > { %s1634_s17 = scalar_lea.vmem [#allocation6], %s823_s29 }
  0x7f   : > { %1249 = dma.done.wait (%p1832_p1), %s284_s6, 2048  }
  0x80   : > { %1251 = vsyncadd (%p1832_p1), %s284_s6, 4294965248  ;;  %s1833_s2 = sld [smem:[#allocation13_spill]]  ;;  %s319_s5 = sand.u32 1, %s1262_s19  }
  0x81   : > { %s824_s16 = sshll.u32 %s319_s5, 4  ;;  %s1834_s28 = sld [smem:[#allocation25_spill]] }
  0x82   : > { %s1651_s27 = scalar_lea.vmem [#allocation8], %s824_s16 }
  0x86   : > { %p323_p6 = scmp.lt.s32.totalorder %s1833_s2, 5  ;;  %p825_p12 = scmp.ne.s32.totalorder %s1833_s2, 0 }
  0x87   : > { %v332_v0 = vld [vmem:[%s278_s24] sm:$0xff] (!%p825_p12)  ;;  %v333_v1 = vld [vmem:[%s278_s24 + $0x8] sm:$0xff] (!%p825_p12)  ;;  %v334_v5 = vld [vmem:[%s278_s24 + $0x10] sm:$0xff] (!%p825_p12)  ;;  %v408_v42 = vlaneseq (!%p825_p12)  ;;  %s1835_s9 = sld [smem:[#allocation23_spill]] (!%p825_p12)  ;;  %s1836_s11 = sld [smem:[#allocation24_spill]] (!%p825_p12) }
  0x88   : > { %s1645_s4 = scalar_select %p323_p6, %s1833_s2, 5 }
  0x89   : > { %331 = sbr.rel (%p825_p12) target bundleno = 463 (0x1cf), region = 52  ;;  %v336_v2 = vld [vmem:[%s278_s24 + $0x20] sm:$0xff] (!%p825_p12)  ;;  %v342_v3 = vadd.f32 (!%p825_p12), %v333_v1, %v332_v0  ;;  %v337_v4 = vld [vmem:[%s278_s24 + $0x28] sm:$0xff] (!%p825_p12)  ;;  %v335_v6 = vld [vmem:[%s278_s24 + $0x18] sm:$0xff] (!%p825_p12)  ;;  %v409_v48 = vshrl.u32 (!%p825_p12), %v408_v42, 7 }
  0x8a   : > { %s325_s0 = scalar_lea.vmem %s1834_s28, %s1645_s4  ;;  %v348_v7 = vadd.f32 (!%p825_p12), %v337_v4, %v336_v2  ;;  %v338_v8 = vld [vmem:[%s278_s24 + $0x30] sm:$0xff] (!%p825_p12)  ;;  %v339_v9 = vld [vmem:[%s278_s24 + $0x38] sm:$0xff] (!%p825_p12)  ;;  %v345_v10 = vadd.f32 (!%p825_p12), %v335_v6, %v334_v5 }
  0x8b   : > { %343 = vadd.xlane.f32.xlu0 (!%p825_p12), %v342_v3  ;;  %v351_v11 = vadd.f32 (!%p825_p12), %v339_v9, %v338_v8  ;;  %v410_v53 = vsub.s32 (!%p825_p12), 0, %v409_v48  ;;  %v414_v54 = vsub.s32 (!%p825_p12), 1, %v409_v48 }
  0x8c   : > { %349 = vadd.xlane.f32.xlu1 (!%p825_p12), %v348_v7 }
  0x8d   : > { %v340_v56 = vld [vmem:[%s1835_s9] sm:$0x3] (!%p825_p12) }
  0x8e   : > { %v411_v58 = vrot.slane (!%p825_p12), %v340_v56, %v410_v53  ;;  %v415_v59 = vrot.slane (!%p825_p12), %v340_v56, %v414_v54  ;;  %v341_v60 = vld [vmem:[%s1836_s11] sm:$0x3] (!%p825_p12) }
  0x8f   : > { %346 = vadd.xlane.f32.xlu0 (!%p825_p12), %v345_v10 }
  0x90   : > { %352 = vadd.xlane.f32.xlu1 %v351_v11 }
 0x118   : > { %v344_v12 = vpop.xlane.xlu0 %343 }
 0x119   : > { %v355_v13 = vmul.f32 0.00390625, %v344_v12  ;;  %v350_v14 = vpop.xlane.xlu1 %349 }
 0x11a   : > { %v357_v15 = vmul.f32 0.00390625, %v350_v14 }
 0x11b   : > { %v359_v16 = vsub.f32 %v332_v0, %v355_v13  ;;  %v360_v17 = vsub.f32 %v333_v1, %v355_v13  ;;  %v430_v0 = vrot.slane %v341_v60, %v410_v53  ;;  %v434_v1 = vrot.slane %v341_v60, %v414_v54 }
 0x11c   : > { %v363_v18 = vsub.f32 %v336_v2, %v357_v15  ;;  %v364_v19 = vsub.f32 %v337_v4, %v357_v15  ;;  %v347_v20 = vpop.xlane.xlu0 %346 }
 0x11d   : > { %v356_v21 = vmul.f32 0.00390625, %v347_v20  ;;  %v353_v22 = vpop.xlane.xlu1 %352  ;;  %v367_v23 = vmul.f32 %v359_v16, %v359_v16  ;;  %v368_v24 = vmul.f32 %v360_v17, %v360_v17 }
 0x11e   : > { %v358_v25 = vmul.f32 0.00390625, %v353_v22  ;;  %v371_v26 = vmul.f32 %v363_v18, %v363_v18  ;;  %v372_v27 = vmul.f32 %v364_v19, %v364_v19 }
 0x11f   : > { %v361_v28 = vsub.f32 %v334_v5, %v356_v21  ;;  %v362_v29 = vsub.f32 %v335_v6, %v356_v21  ;;  %v375_v30 = vadd.f32 %v368_v24, %v367_v23 }
 0x120   : > { %v365_v31 = vsub.f32 %v338_v8, %v358_v25  ;;  %v366_v32 = vsub.f32 %v339_v9, %v358_v25  ;;  %v381_v33 = vadd.f32 %v372_v27, %v371_v26 }
 0x121   : > { %376 = vadd.xlane.f32.xlu0 %v375_v30  ;;  %v369_v34 = vmul.f32 %v361_v28, %v361_v28  ;;  %v370_v35 = vmul.f32 %v362_v29, %v362_v29 }
 0x122   : > { %v373_v36 = vmul.f32 %v365_v31, %v365_v31  ;;  %v374_v37 = vmul.f32 %v366_v32, %v366_v32 }
 0x123   : > { %v378_v38 = vadd.f32 %v370_v35, %v369_v34 }
 0x124   : > { %v384_v39 = vadd.f32 %v374_v37, %v373_v36 }
 0x125   : > { %382 = vadd.xlane.f32.xlu0 %v381_v33  ;;  %379 = vadd.xlane.f32.xlu1 %v378_v38 }
 0x129   : > { %385 = vadd.xlane.f32.xlu1 %v384_v39 }
 0x1ae   : > { %v377_v40 = vpop.xlane.xlu0 %376 }
 0x1af   : > { %v387_v41 = vmul.f32 0.00390625, %v377_v40 }
 0x1b1   : > { %v391_v43 = vadd.f32 1e-05, %v387_v41 }
 0x1b2   : > { %v380_v44 = vpop.xlane.xlu1 %379  ;;  %v383_v45 = vpop.xlane.xlu0 %382 }
 0x1b3   : > { %1068 = vrsqrt.f32 %v391_v43  ;;  %v388_v46 = vmul.f32 0.00390625, %v380_v44  ;;  %v389_v47 = vmul.f32 0.00390625, %v383_v45 }
 0x1b5   : > { %v392_v49 = vadd.f32 1e-05, %v388_v46  ;;  %v393_v50 = vadd.f32 1e-05, %v389_v47 }
 0x1b6   : > { %v386_v51 = vpop.xlane.xlu1 %385 }
 0x1b7   : > { %1070 = vrsqrt.f32 %v392_v49  ;;  %v390_v52 = vmul.f32 0.00390625, %v386_v51 }
 0x1b8   : > { %1072 = vrsqrt.f32 %v393_v50 }
 0x1b9   : > { %v394_v55 = vadd.f32 1e-05, %v390_v52 }
 0x1bb   : > { %1074 = vrsqrt.f32 %v394_v55 }
 0x1bd   : > { %v1069_v57 = vpop.eup %1068 }
 0x1be   : > { %v399_v61 = vmul.f32 %v1069_v57, %v359_v16  ;;  %v400_v62 = vmul.f32 %v1069_v57, %v360_v17 }
 0x1c0   : > { %v418_v2 = vmul.f32 %v411_v58, %v399_v61  ;;  %v419_v3 = vmul.f32 %v415_v59, %v400_v62 }
 0x1c1   : > { %v1071_v63 = vpop.eup %1070 }
 0x1c2   : > { %v1073_v4 = vpop.eup %1072  ;;  %v401_v5 = vmul.f32 %v1071_v63, %v361_v28  ;;  %v402_v6 = vmul.f32 %v1071_v63, %v362_v29  ;;  %v437_v12 = vadd.f32 %v430_v0, %v418_v2  ;;  %v438_v13 = vadd.f32 %v434_v1, %v419_v3 }
 0x1c3   : > { %v403_v7 = vmul.f32 %v1073_v4, %v363_v18  ;;  %v404_v8 = vmul.f32 %v1073_v4, %v364_v19 }
 0x1c4   : > { %v420_v9 = vmul.f32 %v411_v58, %v401_v5  ;;  %v421_v10 = vmul.f32 %v415_v59, %v402_v6 }
 0x1c5   : > { %v1075_v11 = vpop.eup %1074  ;;  %v422_v14 = vmul.f32 %v411_v58, %v403_v7  ;;  %v423_v15 = vmul.f32 %v415_v59, %v404_v8 }
 0x1c6   : > { %v439_v20 = vadd.f32 %v430_v0, %v420_v9  ;;  %v440_v16 = vadd.f32 %v434_v1, %v421_v10  ;;  %v405_v17 = vmul.f32 %v1075_v11, %v365_v31  ;;  %v406_v21 = vmul.f32 %v1075_v11, %v366_v32 }
 0x1c7   : > { %v441_v26 = vadd.f32 %v430_v0, %v422_v14  ;;  %v442_v18 = vadd.f32 %v434_v1, %v423_v15 }
 0x1c8   : > { %v445_v22 = vpack.c.bf16 %v439_v20, %v437_v12  ;;  %v446_v23 = vpack.c.bf16 %v440_v16, %v438_v13  ;;  %v424_v24 = vmul.f32 %v411_v58, %v405_v17  ;;  %v425_v25 = vmul.f32 %v415_v59, %v406_v21 }
 0x1ca   : > { %449 = vst [vmem:[#allocation2] sm:$0xff] %v445_v22  ;;  %450 = vst [vmem:[#allocation2 + $0x8] sm:$0xff] %v446_v23  ;;  %v443_v19 = vadd.f32 %v430_v0, %v424_v24  ;;  %v444_v27 = vadd.f32 %v434_v1, %v425_v25 }
 0x1cc   : > { %v447_v28 = vpack.c.bf16 %v443_v19, %v441_v26  ;;  %v448_v29 = vpack.c.bf16 %v444_v27, %v442_v18 }
 0x1ce   : > { %451 = vst [vmem:[#allocation2 + $0x10] sm:$0xff] %v447_v28  ;;  %452 = vst [vmem:[#allocation2 + $0x18] sm:$0xff] %v448_v29 }
 0x1cf PF: > { %v1076_v30 = vld [vmem:[%s1634_s17 + $0x40] sm:$0xff]   ;;  %v1078_v32 = vld [vmem:[%s1634_s17 + $0x48] sm:$0xff]   ;;  %v1080_v34 = vld [vmem:[%s1634_s17 + $0x50] sm:$0xff]   ;;  %s1837_s29 = sld [smem:[#allocation14_spill]]  ;;  %s1838_s6 = sld [smem:[#allocation15_spill]] }
 0x1d0   : > { %v1077_v31 = vld [vmem:[%s1634_s17] sm:$0xff]   ;;  %871 = vmatprep.subr.bf16.mxu0 %v1076_v30  ;;  %899 = vmatprep.subr.bf16.mxu1 %v1076_v30  ;;  %v1079_v33 = vld [vmem:[%s1634_s17 + $0x8] sm:$0xff]   ;;  %v1081_v35 = vld [vmem:[%s1634_s17 + $0x10] sm:$0xff]   ;;  %s1839_s2 = sld [smem:[#allocation13_spill]]  ;;  %s1841_s10 = sld [smem:[#allocation19_spill]] }
 0x1d1   : > { %872 = vmatpush3.bf16.msra.mxu0 %v1077_v31  ;;  %907 = vmatpush3.bf16.msra.mxu1 %v1077_v31  ;;  %v1082_v36 = vld [vmem:[%s1634_s17 + $0x58] sm:$0xff]   ;;  %v1084_v38 = vld [vmem:[%s1634_s17 + $0x60] sm:$0xff]   ;;  %v1086_v40 = vld [vmem:[%s1634_s17 + $0x68] sm:$0xff]   ;;  %s679_s11 = sshll.u32 %s1651_s27, 4  ;;  %s1696_s4 = scalar_lea.sflag [#allocation5], %s319_s5  ;;  %s1690_s11 = int_to_ptr.vmem [resolvable:$true] %s679_s11 }
 0x1d2   : > { %873 = vmatprep.subr.bf16.mxu0 %v1078_v32  ;;  %900 = vmatprep.subr.bf16.mxu1 %v1078_v32  ;;  %v1083_v37 = vld [vmem:[%s1634_s17 + $0x18] sm:$0xff]   ;;  %v1085_v39 = vld [vmem:[%s1634_s17 + $0x20] sm:$0xff]   ;;  %v454_v41 = vld [vmem:[#allocation2 + $0x8] sm:$0xff] }
 0x1d3   : > { %624 = vmatprep.mubr.bf16.mxu0 %v454_v41  ;;  %v1087_v43 = vld [vmem:[%s1634_s17 + $0x28] sm:$0xff]   ;;  %v1088_v44 = vld [vmem:[%s1634_s17 + $0x70] sm:$0xff]   ;;  %v1090_v46 = vld [vmem:[%s1634_s17 + $0x78] sm:$0xff]  }
 0x1d4   : > { %v1089_v45 = vld [vmem:[%s1634_s17 + $0x30] sm:$0xff]   ;;  %v1091_v47 = vld [vmem:[%s1634_s17 + $0x38] sm:$0xff]   ;;  %v453_v48 = vld [vmem:[#allocation2] sm:$0xff] }
 0x1d5   : > { %874 = vmatpush3.bf16.msra.mxu0 %v1079_v33  ;;  %908 = vmatpush3.bf16.msra.mxu1 %v1079_v33  ;;  %v456_v42 = vld [vmem:[#allocation2 + $0x18] sm:$0xff]  ;;  %v455_v49 = vld [vmem:[#allocation2 + $0x10] sm:$0xff]  ;;  %s848_s16 = sshll.u32 %s1837_s29, 2  ;;  %s849_s1 = sshll.u32 %s1838_s6, 3  ;;  %v826_v58 = vld [vmem:[%s325_s0] ss:$0 sm:$0xff] }
 0x1d6   : > { %875 = vmatprep.subr.bf16.mxu0 %v1080_v34  ;;  %901 = vmatprep.subr.bf16.mxu1 %v1080_v34  ;;  %s674_s15 = sadd.s32 %s849_s1, %s848_s16  ;;  %s850_s28 = sshll.u32 %s1839_s2, 4 }
 0x1d7   : > { %632 = vmatprep.mubr.bf16.mxu1 %v456_v42  ;;  %s676_s21 = sadd.s32 %s850_s28, %s674_s15  ;;  %s1842_s2 = sld [smem:[#allocation26_spill]] }
 0x1d8   : > { %s851_s24 = sshll.u32 %s676_s21, 6  ;;  %s1152_s0 = scalar_lea.vmem %s1690_s11, 256 }
 0x1d9   : > { %876 = vmatpush3.bf16.msra.mxu0 %v1081_v35  ;;  %909 = vmatpush3.bf16.msra.mxu1 %v1081_v35  ;;  %p1153_p11 = scmp.ne.s32.totalorder %s1690_s11, %s1152_s0  ;;  %p1843_p2 = scmp.ne.s32.totalorder %s1841_s10, 0 }
 0x1da   : > { %877 = vmatprep.subr.bf16.mxu0 %v1082_v36  ;;  %902 = vmatprep.subr.bf16.mxu1 %v1082_v36  ;;  %s1326_s1 = smov [#allocation8]  }
 0x1db   : > { %p1154_p3 = pnand %p1153_p11, %p1843_p2  ;;  %s1156_s15 = sshll.u32 %s1326_s1, 4  ;;  %s1157_s15 = int_to_ptr.vmem [resolvable:$false] %s1156_s15 }
 0x1dc   : > { %s1158_s28 = scalar_lea.vmem %s1157_s15, 512  ;;  %p1159_p9 = scmp.lt.s32.totalorder %s1690_s11, %s1157_s15 }
 0x1dd   : > { %878 = vmatpush3.bf16.msra.mxu0 %v1083_v37  ;;  %910 = vmatpush3.bf16.msra.mxu1 %v1083_v37  ;;  %s1688_s16 = scalar_lea.hbm %s1842_s2, %s851_s24  ;;  %p1155_p8 = pneg %p1154_p3 }
 0x1de   : > { %879 = vmatprep.subr.bf16.mxu0 %v1084_v38  ;;  %903 = vmatprep.subr.bf16.mxu1 %v1084_v38  ;;  %p1160_p0 = scmp.lt.s32.totalorder %s1158_s28, %s1152_s0 }
 0x1e0   : > { %p1161_p5 = por %p1160_p0, %p1159_p9 }
 0x1e1   : > { %880 = vmatpush3.bf16.msra.mxu0 %v1085_v39  ;;  %911 = vmatpush3.bf16.msra.mxu1 %v1085_v39 }
 0x1e2   : > { %881 = vmatprep.subr.bf16.mxu0 %v1086_v40  ;;  %904 = vmatprep.subr.bf16.mxu1 %v1086_v40  ;;  %p1162_p4 = pnand %p1161_p5, %p1155_p8 }
 0x1e5   : > { %882 = vmatpush3.bf16.msra.mxu0 %v1087_v43  ;;  %912 = vmatpush3.bf16.msra.mxu1 %v1087_v43 }
 0x1e6   : > { %883 = vmatprep.subr.bf16.mxu0 %v1088_v44  ;;  %905 = vmatprep.subr.bf16.mxu1 %v1088_v44 }
 0x1e9   : > { %884 = vmatpush3.bf16.msra.mxu0 %v1089_v45  ;;  %913 = vmatpush3.bf16.msra.mxu1 %v1089_v45 }
 0x1ea   : > { %885 = vmatprep.subr.bf16.mxu0 %v1090_v46  ;;  %906 = vmatprep.subr.bf16.mxu1 %v1090_v46 }
 0x1ed   : > { %886 = vmatpush3.bf16.msra.mxu0 %v1091_v47  ;;  %914 = vmatpush3.bf16.msra.mxu1 %v1091_v47 }
 0x1f0   : > { %625 = vmatmul.mubr.bf16.vlgmr.msra.gmra.mrb[0].mxu0 %v453_v48  ;;  %633 = vmatmul.mubr.bf16.vlgmr.msra.gmra.mrb[0].mxu1 %v455_v49 }
 0x2c3   : > { %v887_v50 = vpop.f32.mrb[0].mxu0  ;;  %v893_v51 = vpop.f32.mrb[0].mxu1 }
 0x2c4   : > { %v888_v52 = vpop.f32.mrb[1].mxu0  ;;  %v894_v53 = vpop.f32.mrb[1].mxu1 }
 0x2c5   : > { %v889_v54 = vadd.f32 %v888_v52, %v887_v50  ;;  %v895_v55 = vadd.f32 %v894_v53, %v893_v51  ;;  %v890_v56 = vpop.f32.mrb[2].mxu0  ;;  %v896_v57 = vpop.f32.mrb[2].mxu1 }
 0x2c6   : > { %v891_v59 = vpop.f32.mrb[3].mxu0  ;;  %v897_v60 = vpop.f32.mrb[3].mxu1 }
 0x2c7   : > { %v892_v61 = vadd.f32 %v891_v59, %v890_v56  ;;  %v898_v62 = vadd.f32 %v897_v60, %v896_v57  ;;  %v627_v63 = vadd.f32 %v889_v54, %v826_v58  ;;  %v635_v0 = vadd.f32 %v895_v55, %v826_v58 }
 0x2c9   : > { %v630_v1 = vadd.f32 %v892_v61, %v826_v58  ;;  %v638_v2 = vadd.f32 %v898_v62, %v826_v58 }
 0x2cb   : > { %v863_v3 = vpack.c.bf16 %v630_v1, %v627_v63  ;;  %v868_v4 = vpack.c.bf16 %v638_v2, %v635_v0 }
 0x2cd   : > { %864 = vst [vmem:[%s1651_s27] sm:$0xff] %v863_v3   ;;  %870 = vst [vmem:[%s1651_s27 + $0x8] sm:$0xff] %v868_v4  }
 0x2ce   : > { %1165 = shalt.err (!%p1162_p4)
}
 0x2cf   : > { %s1166_s5 = scalar_lea.hbm %s1688_s16, 256  ;;  %s1170_s17 = scalar_lea.hbm %s1842_s2, 6144 }
 0x2d0   : > { %p1167_p7 = scmp.ne.s32.totalorder %s1688_s16, %s1166_s5  ;;  %p1171_p1 = scmp.lt.u32.totalorder %s1688_s16, %s1842_s2 }
 0x2d1   : > { %p1172_p6 = scmp.lt.u32.totalorder %s1170_s17, %s1166_s5  ;;  %p1174_p11 = scmp.lt.u32.totalorder %s1166_s5, %s1688_s16 }
 0x2d2   : > { %p1168_p10 = pnand %p1167_p7, %p1843_p2 }
 0x2d3   : > { %p1173_p12 = por %p1172_p6, %p1171_p1 }
 0x2d4   : > { %p1169_p13 = pneg %p1168_p10 }
 0x2d5   : > { %p1175_p3 = por %p1174_p11, %p1173_p12 }
 0x2d7   : > { %p1176_p8 = pnand %p1175_p3, %p1169_p13 }
 0x2d9   : > { %1179 = shalt.err (!%p1176_p8)
}
 0x2da   : > { %s1327_s24 = smov 64   ;;  %s1328_s29 = smov 4  }
 0x2db   : > { %919 = dma.vmem_to_hbm [thread:$0]  (%p1843_p2), %s1690_s11, 256, %s1688_s16, %s1696_s4, %s1327_s24, %s1327_s24, %s1328_s29  }
 0x2dc PF: > { %s1844_s6 = sld [smem:[#allocation12_spill]]  ;;  %p933_p9 = scmp.ge.s32.totalorder %s1318_s8, 2 }
 0x2dd   : > { %p1845_p0 = scmp.ne.s32.totalorder %s1827_s12, 0 }
 0x2df   : > { %p929_p5 = pnand %p933_p9, %p1845_p0 }
 0x2e2   : > { %s694_s0 = sand.u32 1, %s1844_s6  }
 0x2e3   : > { %s695_s1 = scalar_lea.sflag [#allocation5], %s694_s0 }
 0x2e4   : > { %1253 = dma.done.wait (!%p929_p5), %s695_s1, 256  }
 0x2e5   : > { %1255 = vsyncadd (!%p929_p5), %s695_s1, 4294967040  ;;  %s24_s8 = sadd.s32 1, %s1318_s8   ;;  %s1847_s10 = sld [smem:[#allocation20_spill]] }
 0x2e6   : > { %p1725_p4 = scmp.ge.s32.totalorder %s24_s8, 26   ;;  %s1848_s28 = sld [smem:[#allocation16_spill]] }
 0x2e7   : > { %s1849_s12 = sld [smem:[#allocation17_spill]]  ;;  %s1850_s6 = sld [smem:[#allocation18_spill]] }
 0x2e8   : > { %s1851_s11 = sld [smem:[#allocation21_spill]]  ;;  %s1852_s18 = smov %s1262_s19 }
 0x2e9   : > { %s1853_s19 = smov %s1266_s20  ;;  %s1854_s20 = smov %s1580_s13 }
 0x2ea   : > { %s1855_s21 = smov %s1274_s22  ;;  %s1856_s22 = smov %s1278_s23 }
 0x2eb   : > { %s1857_s23 = smov %s1847_s10  ;;  %s1858_s24 = smov %s1286_s25 }
 0x2ec   : > { %s1859_s25 = smov %s1290_s26  ;;  %s1860_s26 = smov %s1577_s14 }
 0x2ed   : > { %s1861_s27 = smov %s1306_s30  ;;  %s1862_s29 = smov %s1314_s7 }
 0x2ee   : > { %s1863_s30 = smov %s1849_s12  ;;  %s1864_s7 = smov %s1851_s11 }
 0x2ef   :  { %23 = sbr.rel (!%p1725_p4) target bundleno = 19 (0x13), region = 105 }
 0x2f6   :  { %700 = vsyncpa [#allocation4], 1 }
 0x2f7   :  { %702 = vsyncpa [#allocation4 + $0x1], 1 }
 0x2f8   :  { %703 = vsyncpa [#allocation7], 1 }
 0x2f9   :  { %705 = vsyncpa [#allocation7 + $0x1], 1 }
 0x2fa   :  { %706 = vsyncpa [#allocation5], 1 }
 0x2fb   :  { %708 = vsyncpa [#allocation5 + $0x1], 1 }

</bundles_post_ra>
